<compile_context>
chip_gen: v7x
topology: tpu7x:2x2x1
jax: 0.10.0
libtpu: 0.0.40
codegen_flags: <defaults>
</compile_context>

<pallas_src>
import functools

import jax
import jax.numpy as jnp
from jax import lax
from jax.experimental import pallas as pl
from jax.experimental.pallas import tpu as pltpu

_EPSILON = 1e-5
_LANES = 128
_SUBLANES = 8
_ROW_CHUNK = 1024                    # rows per in-kernel accumulation chunk
_INPUT_VMEM_BUDGET = 16 << 20        # target bytes of double-buffered input tiles
_VMEM_LIMIT_CAP = 48 << 20           # stay under v7x's 64 MiB/TC physical VMEM


def _esr_kernel(pred_ref, tgt_ref, err_ref, en_ref, *,
                tile_rows, row_chunk, blocks_per_core, rows_total,
                full_blocks, needs_mask):
    """Accumulates sum((t-p)^2) and sum(t^2) into per-core (8,128) f32 blocks."""
    c = pl.program_id(0)   # TensorCore-split axis
    i = pl.program_id(1)   # streaming reduction axis

    @pl.when(i == 0)
    def _():
        err_ref[...] = jnp.zeros_like(err_ref)
        en_ref[...] = jnp.zeros_like(en_ref)

    n_chunks = tile_rows // row_chunk   # static; tile_rows % row_chunk == 0

    def accumulate(valid_rows):
        """valid_rows: None (fully-valid block) or traced scalar valid-row count."""
        if valid_rows is not None:
            # Hoisted once per masked block; compared against a scalar per
            # chunk instead of rebuilding a global row index element-wise.
            local_iota = lax.broadcasted_iota(jnp.int32, (row_chunk, _LANES), 0)

        def body(k, carry):
            err_acc, en_acc = carry
            r0 = pl.multiple_of(k * row_chunk, row_chunk)
            t = tgt_ref[pl.ds(r0, row_chunk), :].astype(jnp.float32)
            p = pred_ref[pl.ds(r0, row_chunk), :].astype(jnp.float32)
            if valid_rows is not None:
                keep = local_iota < (valid_rows - r0)
                t = jnp.where(keep, t, 0.0)
                p = jnp.where(keep, p, 0.0)
            diff = t - p
            # Reduce only across the major (sublane-group) axis: pure VPU adds
            # that hide under the input DMA.  Final cross-lane reduce deferred.
            err_acc = err_acc + jnp.sum(
                (diff * diff).reshape(-1, _SUBLANES, _LANES), axis=0)
            en_acc = en_acc + jnp.sum(
                (t * t).reshape(-1, _SUBLANES, _LANES), axis=0)
            return err_acc, en_acc

        zeros = jnp.zeros((_SUBLANES, _LANES), jnp.float32)
        err_c, en_c = lax.fori_loop(0, n_chunks, body, (zeros, zeros),
                                    unroll=True)
        err_ref[...] += err_c
        en_ref[...] += en_c

    if needs_mask:
        # NOTE: `blk` must mirror the UNCLAMPED index used by the input
        # index_map before clamping.  Duplicate trailing blocks on the last
        # core re-read the clamped last data block, but valid_rows <= 0 masks
        # them out entirely, so they contribute nothing.  Keep this coupled
        # with `in_map` in esr_loss().
        blk = c * blocks_per_core + i

        @pl.when(blk < full_blocks)
        def _():
            accumulate(None)          # steady state: no per-element masking

        @pl.when(blk >= full_blocks)
        def _():
            accumulate(rows_total - blk * tile_rows)
    else:
        accumulate(None)


def _num_tensorcores() -> int:
    """2 on v7x (2 TCs/chip -> CORE_PARALLEL split); 1 on v5e/v6e."""
    try:
        kind = (jax.devices()[0].device_kind or "").lower()
    except Exception:
        return 1
    return 2 if ("v7" in kind or "tpu7" in kind) else 1


def esr_loss(output: jax.Array, target: jax.Array, *, tile_rows: int = 8192) -> jax.Array:
    """Computes ESR loss; returns a scalar float32 (mirrors torch forward)."""
    assert output.shape == target.shape, "output/target shapes must match"
    n_true = output.size

    flat_p = jnp.ravel(output)   # free metadata op for contiguous inputs
    flat_t = jnp.ravel(target)

    chunk = _SUBLANES * _LANES                     # 1024 elements
    n_main = (n_true // chunk) * chunk             # kernel-processed prefix

    err_sum = jnp.float32(0.0)
    en_sum = jnp.float32(0.0)

    if n_main > 0:
        rows = n_main // _LANES                    # multiple of 8
        elsize = jnp.dtype(flat_p.dtype).itemsize

        # ---- tile sizing (validated: tr is a multiple of row_chunk, <= rows)
        if rows >= _ROW_CHUNK:
            budget_rows = _INPUT_VMEM_BUDGET // (2 * 2 * _LANES * elsize)
            tr = min(int(tile_rows), int(budget_rows), rows)
            tr = max(_ROW_CHUNK, (tr // _ROW_CHUNK) * _ROW_CHUNK)
            row_chunk = _ROW_CHUNK
        else:
            tr = rows               # full extent; small tile, single chunk
            row_chunk = rows

        num_blocks = pl.cdiv(rows, tr)
        num_cores = _num_tensorcores() if num_blocks >= 2 else 1
        bpc = pl.cdiv(num_blocks, num_cores)
        needs_mask = (num_cores * bpc * tr) != rows
        full_blocks = rows // tr                   # blocks with no partial rows
        last_blk = num_blocks - 1

        if n_main == n_true:
            slab_p = flat_p.reshape(rows, _LANES)
            slab_t = flat_t.reshape(rows, _LANES)
        else:
            slab_p = lax.slice(flat_p, (0,), (n_main,)).reshape(rows, _LANES)
            slab_t = lax.slice(flat_t, (0,), (n_main,)).reshape(rows, _LANES)

        # Clamp only when the rectangular grid over-covers the blocks; the
        # kernel's masked branch zeroes the duplicate blocks' contribution.
        if num_cores * bpc != num_blocks:
            in_map = lambda c, i: (jnp.minimum(c * bpc + i, last_blk), 0)
        else:
            in_map = lambda c, i: (c * bpc + i, 0)
        out_map = lambda c, i: (c, 0)

        kernel = functools.partial(
            _esr_kernel,
            tile_rows=tr,
            row_chunk=row_chunk,
            blocks_per_core=bpc,
            rows_total=rows,
            full_blocks=full_blocks,
            needs_mask=needs_mask,
        )

        arb = getattr(pltpu, "ARBITRARY", "arbitrary")
        if num_cores == 2:
            lead = getattr(pltpu, "CORE_PARALLEL",
                           getattr(pltpu, "PARALLEL", "parallel"))
        else:
            lead = arb

        in_buf_bytes = 2 * 2 * tr * _LANES * elsize        # 2 inputs, double buffered
        vmem_limit = int(min(in_buf_bytes + (16 << 20), _VMEM_LIMIT_CAP))

        cost = pl.CostEstimate(
            flops=5 * n_main,
            transcendentals=0,
            bytes_accessed=2 * n_main * elsize
                           + 2 * num_cores * _SUBLANES * _LANES * 4,
        )

        err_part, en_part = pl.pallas_call(
            kernel,
            out_shape=(
                jax.ShapeDtypeStruct((num_cores * _SUBLANES, _LANES), jnp.float32),
                jax.ShapeDtypeStruct((num_cores * _SUBLANES, _LANES), jnp.float32),
            ),
            grid_spec=pltpu.PrefetchScalarGridSpec(
                num_scalar_prefetch=0,
                grid=(num_cores, bpc),
                in_specs=[
                    pl.BlockSpec((tr, _LANES), in_map),
                    pl.BlockSpec((tr, _LANES), in_map),
                ],
                out_specs=[
                    pl.BlockSpec((_SUBLANES, _LANES), out_map),
                    pl.BlockSpec((_SUBLANES, _LANES), out_map),
                ],
            ),
            compiler_params=pltpu.CompilerParams(
                dimension_semantics=(lead, arb),
                vmem_limit_bytes=vmem_limit,
            ),
            cost_estimate=cost,
        )(slab_p, slab_t)

        # NOTE: binned accumulation (1024 f32 bins then a final sum) rounds
        # slightly differently from a single-pass mean; well within rtol=1e-5.
        err_sum = err_sum + jnp.sum(err_part)
        en_sum = en_sum + jnp.sum(en_part)

    if n_main < n_true:
        # Tiny ragged tail (< 1024 elements): plain JAX, negligible cost.
        tail_p = flat_p[n_main:].astype(jnp.float32)
        tail_t = flat_t[n_main:].astype(jnp.float32)
        err_sum = err_sum + jnp.sum(jnp.square(tail_t - tail_p))
        en_sum = en_sum + jnp.sum(jnp.square(tail_t))

    n = jnp.float32(n_true)
    mse = err_sum / n
    energy = en_sum / n
    return mse / (energy + jnp.float32(_EPSILON))


def _esr_reference(output, target):
    loss = jnp.mean(jnp.square(target.astype(jnp.float32) - output.astype(jnp.float32)))
    energy = jnp.mean(jnp.square(target.astype(jnp.float32)))
    return loss / (energy + _EPSILON)


if __name__ == "__main__":
    key = jax.random.PRNGKey(0)
    k_out, k_tgt = jax.random.split(key)
    # Small NCHW-shaped tensors (batch=2, channels=4, 16x16 spatial).
    x_out = jax.random.normal(k_out, (2, 4, 16, 16), dtype=jnp.float32)
    x_tgt = jax.random.normal(k_tgt, (2, 4, 16, 16), dtype=jnp.float32)

    loss = esr_loss(x_out, x_tgt)
    jax.block_until_ready(loss)

    ref = _esr_reference(x_out, x_tgt)
    assert jnp.allclose(loss, ref, rtol=1e-5, atol=1e-6), (loss, ref)
    print("KERNEL_OK")
</pallas_src>

<mosaic_0001>
module attributes {stable_mosaic.version = 11 : i64} {
  func.func @_esr_kernel(%arg0: i32, %arg1: i32, %arg2: memref<16x128xf32, #tpu.memory_space<vmem>>, %arg3: memref<16x128xf32, #tpu.memory_space<vmem>>, %arg4: memref<8x128xf32, #tpu.memory_space<vmem>>, %arg5: memref<8x128xf32, #tpu.memory_space<vmem>>) attributes {dimension_semantics = [#tpu.dimension_semantics<arbitrary>, #tpu.dimension_semantics<arbitrary>], iteration_bounds = array<i64: 1, 1>, scalar_prefetch = 0 : i64, scratch_operands = 0 : i64, tpu.core_type = #tpu.core_type<tc>, window_params = [{transform_indices = @transform_0, window_bounds = array<i64: 16, 128>}, {transform_indices = @transform_1, window_bounds = array<i64: 16, 128>}, {transform_indices = @transform_2, window_bounds = array<i64: 8, 128>}, {transform_indices = @transform_3, window_bounds = array<i64: 8, 128>}]} {
    %c0_i32 = arith.constant 0 : i32
    %0 = arith.cmpi eq, %arg1, %c0_i32 : i32
    %1 = arith.extui %0 : i1 to i32
    %c0_i32_0 = arith.constant 0 : i32
    %2 = arith.cmpi ne, %1, %c0_i32_0 : i32
    scf.if %2 {
      %cst_13 = arith.constant 0.000000e+00 : f32
      %25 = vector.broadcast %cst_13 : f32 to vector<8x128xf32>
      %c0_14 = arith.constant 0 : index
      %c0_15 = arith.constant 0 : index
      %26 = vector.load %arg4[%c0_14, %c0_15] : memref<8x128xf32, #tpu.memory_space<vmem>>, vector<8x128xf32>
      tpu.vector_store %arg4[%c0_14, %c0_15], %25 {strides = array<i32>} : memref<8x128xf32, #tpu.memory_space<vmem>>, vector<8x128xf32>,
      %cst_16 = arith.constant 0.000000e+00 : f32
      %27 = vector.broadcast %cst_16 : f32 to vector<8x128xf32>
      %c0_17 = arith.constant 0 : index
      %c0_18 = arith.constant 0 : index
      %28 = vector.load %arg5[%c0_17, %c0_18] : memref<8x128xf32, #tpu.memory_space<vmem>>, vector<8x128xf32>
      tpu.vector_store %arg5[%c0_17, %c0_18], %27 {strides = array<i32>} : memref<8x128xf32, #tpu.memory_space<vmem>>, vector<8x128xf32>,
    } else {
    }
    %cst = arith.constant 0.000000e+00 : f32
    %3 = vector.broadcast %cst : f32 to vector<8x128xf32>
    %c0_i32_1 = arith.constant 0 : i32
    %c16_i32 = arith.constant 16 : i32
    %4 = arith.muli %c0_i32_1, %c16_i32 : i32
    %5 = tpu.assume_multiple %4, 16 : i32
    %6 = arith.index_cast %5 : i32 to index
    %c0 = arith.constant 0 : index
    %7 = vector.load %arg3[%6, %c0] : memref<16x128xf32, #tpu.memory_space<vmem>>, vector<16x128xf32>
    %8 = arith.index_cast %5 : i32 to index
    %c0_2 = arith.constant 0 : index
    %9 = vector.load %arg2[%8, %c0_2] : memref<16x128xf32, #tpu.memory_space<vmem>>, vector<16x128xf32>
    %10 = arith.subf %7, %9 : vector<16x128xf32>
    %11 = arith.mulf %10, %10 : vector<16x128xf32>
    %12 = vector.shape_cast %11 : vector<16x128xf32> to vector<2x8x128xf32>
    %cst_3 = arith.constant dense<0.000000e+00> : vector<8x128xf32>
    %13 = vector.multi_reduction <add>, %12, %cst_3 [0] : vector<2x8x128xf32> to vector<8x128xf32>
    %14 = arith.addf %3, %13 : vector<8x128xf32>
    %15 = arith.mulf %7, %7 : vector<16x128xf32>
    %16 = vector.shape_cast %15 : vector<16x128xf32> to vector<2x8x128xf32>
    %cst_4 = arith.constant dense<0.000000e+00> : vector<8x128xf32>
    %17 = vector.multi_reduction <add>, %16, %cst_4 [0] : vector<2x8x128xf32> to vector<8x128xf32>
    %18 = arith.addf %3, %17 : vector<8x128xf32>
    %c1_i32 = arith.constant 1 : i32
    %c0_5 = arith.constant 0 : index
    %c0_6 = arith.constant 0 : index
    %19 = vector.load %arg4[%c0_5, %c0_6] : memref<8x128xf32, #tpu.memory_space<vmem>>, vector<8x128xf32>
    %20 = arith.addf %19, %14 : vector<8x128xf32>
    %c0_7 = arith.constant 0 : index
    %c0_8 = arith.constant 0 : index
    %21 = vector.load %arg4[%c0_7, %c0_8] : memref<8x128xf32, #tpu.memory_space<vmem>>, vector<8x128xf32>
    tpu.vector_store %arg4[%c0_7, %c0_8], %20 {strides = array<i32>} : memref<8x128xf32, #tpu.memory_space<vmem>>, vector<8x128xf32>,
    %c0_9 = arith.constant 0 : index
    %c0_10 = arith.constant 0 : index
    %22 = vector.load %arg5[%c0_9, %c0_10] : memref<8x128xf32, #tpu.memory_space<vmem>>, vector<8x128xf32>
    %23 = arith.addf %22, %18 : vector<8x128xf32>
    %c0_11 = arith.constant 0 : index
    %c0_12 = arith.constant 0 : index
    %24 = vector.load %arg5[%c0_11, %c0_12] : memref<8x128xf32, #tpu.memory_space<vmem>>, vector<8x128xf32>
    tpu.vector_store %arg5[%c0_11, %c0_12], %23 {strides = array<i32>} : memref<8x128xf32, #tpu.memory_space<vmem>>, vector<8x128xf32>,
    return
  }
  func.func @transform_0(%arg0: i32, %arg1: i32) -> (i32, i32) {
    %c1_i32 = arith.constant 1 : i32
    %0 = arith.muli %arg0, %c1_i32 : i32
    %1 = arith.addi %0, %arg1 : i32
    %c0_i32 = arith.constant 0 : i32
    %c0_i32_0 = arith.constant 0 : i32
    return %1, %c0_i32 : i32, i32
  }
  func.func @transform_1(%arg0: i32, %arg1: i32) -> (i32, i32) {
    %c1_i32 = arith.constant 1 : i32
    %0 = arith.muli %arg0, %c1_i32 : i32
    %1 = arith.addi %0, %arg1 : i32
    %c0_i32 = arith.constant 0 : i32
    %c0_i32_0 = arith.constant 0 : i32
    return %1, %c0_i32 : i32, i32
  }
  func.func @transform_2(%arg0: i32, %arg1: i32) -> (i32, i32) {
    %c0_i32 = arith.constant 0 : i32
    %c0_i32_0 = arith.constant 0 : i32
    return %arg0, %c0_i32 : i32, i32
  }
  func.func @transform_3(%arg0: i32, %arg1: i32) -> (i32, i32) {
    %c0_i32 = arith.constant 0 : i32
    %c0_i32_0 = arith.constant 0 : i32
    return %arg0, %c0_i32 : i32, i32
  }
}

</mosaic_0001>

<bundles_post_ra>
// kernel: tpu_custom_call.1
= control target key start
LH: loop header
LB: loop body
LE: loop exit
PB: predicated region body
PF: predicated region fallthrough
CT: control target
= control target key end

     0   :  { %9 = vsyncpa [#allocation3], 0  ;;  %s288_s0 = inlined_call_operand.hbm [shape: f32[16,128], index: 0, kind: input, shape index: {}]   ;;  %s289_s1 = inlined_call_operand.hbm [shape: f32[16,128], index: 1, kind: input, shape index: {}]   ;;  %s290_s2 = inlined_call_operand.hbm [shape: f32[8,128], index: 2, kind: output, shape index: {0}]   ;;  %s291_s3 = inlined_call_operand.hbm [shape: f32[8,128], index: 3, kind: output, shape index: {1}]  }
   0x1   :  { %10 = vsyncpa [#allocation6], 0 }
   0x2   :  { %11 = vsyncpa [#allocation4], 0 }
   0x3   :  { %12 = vsyncpa [#allocation9], 0  ;;  %s214_s12 = smov [#allocation2]   ;;  %s118_s16 = scalar_lea.hbm %s288_s0, 256 }
   0x4   :  { %s22_s13 = sshll.u32 %s214_s12, 4  ;;  %p119_p0 = scmp.ne.s32.totalorder %s288_s0, %s118_s16  ;;  %s23_s13 = int_to_ptr.vmem [resolvable:$true] %s22_s13 }
   0x5   :  { %p122_p1 = scmp.lt.u32.totalorder %s118_s16, %s288_s0 }
   0x7   :  { %p124_p2 = pnand %p122_p1, %p119_p0 }
   0x9   :  { %127 = shalt.err (!%p124_p2)
}
   0xa   :  { %s128_s21 = scalar_lea.vmem %s23_s13, 256  ;;  %p133_p4 = scmp.lt.s32.totalorder %s23_s13, %s23_s13 }
   0xb   :  { %p129_p3 = scmp.ne.s32.totalorder %s23_s13, %s128_s21  ;;  %p134_p5 = scmp.lt.s32.totalorder %s128_s21, %s128_s21 }
   0xd   :  { %p135_p6 = por %p134_p5, %p133_p4 }
   0xf   :  { %p136_p7 = pnand %p135_p6, %p129_p3 }
  0x11   :  { %139 = shalt.err (!%p136_p7)
}
  0x12   :  { %s215_s22 = smov 128   ;;  %s216_s23 = smov 8  }
  0x13   :  { %28 = dma.hbm_to_vmem [thread:$0]  %s288_s0, 256, %s23_s13, [#allocation3], %s215_s22, %s215_s22, %s216_s23  }
  0x14   :  { %s217_s26 = smov [#allocation5]   ;;  %s140_s30 = scalar_lea.hbm %s289_s1, 256 }
  0x15   :  { %s38_s27 = sshll.u32 %s217_s26, 4  ;;  %p141_p8 = scmp.ne.s32.totalorder %s289_s1, %s140_s30  ;;  %s39_s27 = int_to_ptr.vmem [resolvable:$true] %s38_s27 }
  0x16   :  { %p144_p9 = scmp.lt.u32.totalorder %s140_s30, %s289_s1 }
  0x18   :  { %p146_p10 = pnand %p144_p9, %p141_p8 }
  0x1a   :  { %149 = shalt.err (!%p146_p10)
}
  0x1b   :  { %s150_s8 = scalar_lea.vmem %s39_s27, 256  ;;  %p155_p12 = scmp.lt.s32.totalorder %s39_s27, %s39_s27 }
  0x1c   :  { %p151_p11 = scmp.ne.s32.totalorder %s39_s27, %s150_s8  ;;  %p156_p13 = scmp.lt.s32.totalorder %s150_s8, %s150_s8 }
  0x1e   :  { %p157_p0 = por %p156_p13, %p155_p12 }
  0x20   :  { %p158_p1 = pnand %p157_p0, %p151_p11 }
  0x22   :  { %161 = shalt.err (!%p158_p1)
}
  0x23   :  { %44 = dma.hbm_to_vmem [thread:$0]  %s289_s1, 256, %s39_s27, [#allocation6], %s215_s22, %s215_s22, %s216_s23  }
  0x24   :  { %206 = dma.done.wait [#allocation3], 256  }
  0x25   :  { %207 = vsyncadd [#allocation3], 4294967040 }
  0x26   :  { %208 = dma.done.wait [#allocation6], 256  }
  0x27   :  { %209 = vsyncadd [#allocation6], 4294967040  ;;  %v61_v0 = vld [vmem:[#allocation5] sm:$0xff]  ;;  %v62_v1 = vld [vmem:[#allocation5 + $0x8] sm:$0xff]  ;;  %s218_s10 = smov [#allocation8]   ;;  %s219_s12 = smov [#allocation7]  }
  0x28   :  { %v63_v2 = vld [vmem:[#allocation2] sm:$0xff]  ;;  %v64_v3 = vld [vmem:[#allocation2 + $0x8] sm:$0xff]  ;;  %v71_v5 = vmul.f32 %v61_v0, %v61_v0  ;;  %v72_v6 = vmul.f32 %v62_v1, %v62_v1  ;;  %s97_s11 = sshll.u32 %s218_s10, 4  ;;  %s87_s13 = sshll.u32 %s219_s12, 4  ;;  %s98_s11 = int_to_ptr.vmem [resolvable:$true] %s97_s11  ;;  %s88_s13 = int_to_ptr.vmem [resolvable:$true] %s87_s13 }
  0x29   :  { %v65_v4 = vsub.f32 %v61_v0, %v63_v2  ;;  %v66_v7 = vsub.f32 %v62_v1, %v64_v3  ;;  %s162_s1 = scalar_lea.vmem %s98_s11, 128  ;;  %p167_p3 = scmp.lt.s32.totalorder %s98_s11, %s98_s11 }
  0x2a   :  { %v73_v9 = vadd.f32 %v72_v6, %v71_v5  ;;  %p163_p2 = scmp.ne.s32.totalorder %s98_s11, %s162_s1  ;;  %p168_p4 = scmp.lt.s32.totalorder %s162_s1, %s162_s1 }
  0x2b   :  { %v67_v8 = vmul.f32 %v65_v4, %v65_v4  ;;  %v68_v10 = vmul.f32 %v66_v7, %v66_v7 }
  0x2c   :  { %80 = vst [vmem:[#allocation8] sm:$0xff] %v73_v9  ;;  %p169_p5 = por %p168_p4, %p167_p3 }
  0x2d   :  { %v69_v11 = vadd.f32 %v68_v10, %v67_v8 }
  0x2e   :  { %p170_p6 = pnand %p169_p5, %p163_p2 }
  0x30   :  { %173 = shalt.err (!%p170_p6)
}
  0x31   :  { %s174_s16 = scalar_lea.hbm %s291_s3, 128 }
  0x32   :  { %p175_p7 = scmp.ne.s32.totalorder %s291_s3, %s174_s16  ;;  %p178_p8 = scmp.lt.u32.totalorder %s174_s16, %s291_s3 }
  0x34   :  { %p180_p9 = pnand %p178_p8, %p175_p7 }
  0x36   :  { %183 = shalt.err (!%p180_p9)
}
  0x37   :  { %100 = dma.vmem_to_hbm [thread:$0]  %s98_s11, 128, %s291_s3, [#allocation9]   ;;  %77 = vst [vmem:[#allocation7] sm:$0xff] %v69_v11 }
  0x38   :  { %s184_s23 = scalar_lea.vmem %s88_s13, 128  ;;  %p189_p11 = scmp.lt.s32.totalorder %s88_s13, %s88_s13 }
  0x39   :  { %p185_p10 = scmp.ne.s32.totalorder %s88_s13, %s184_s23  ;;  %p190_p12 = scmp.lt.s32.totalorder %s184_s23, %s184_s23 }
  0x3b   :  { %p191_p13 = por %p190_p12, %p189_p11 }
  0x3d   :  { %p192_p0 = pnand %p191_p13, %p185_p10 }
  0x3f   :  { %195 = shalt.err (!%p192_p0)
}
  0x40   :  { %s196_s26 = scalar_lea.hbm %s290_s2, 128 }
  0x41   :  { %p197_p1 = scmp.ne.s32.totalorder %s290_s2, %s196_s26  ;;  %p200_p2 = scmp.lt.u32.totalorder %s196_s26, %s290_s2 }
  0x43   :  { %p202_p3 = pnand %p200_p2, %p197_p1 }
  0x45   :  { %205 = shalt.err (!%p202_p3)
}
  0x46   :  { %90 = dma.vmem_to_hbm [thread:$0]  %s88_s13, 128, %s290_s2, [#allocation4]  }
  0x47   :  { %210 = dma.done.wait [#allocation4], 128  }
  0x48   :  { %211 = vsyncadd [#allocation4], 4294967168 }
  0x49   :  { %212 = dma.done.wait [#allocation9], 128  }
  0x4a   :  { %213 = vsyncadd [#allocation9], 4294967168 }
  0x4b   :  { %107 = vsyncpa [#allocation3], 1 }
  0x4c   :  { %108 = vsyncpa [#allocation6], 1 }
  0x4d   :  { %109 = vsyncpa [#allocation4], 1 }
  0x4e   :  { %110 = vsyncpa [#allocation9], 1 }

</bundles_post_ra>
